<compile_context>
chip_gen: v6e
topology: v6e:2x2x1
jax: 0.10.0
libtpu: 0.0.40
codegen_flags: <defaults>
</compile_context>

<pallas_src>
import numpy as np
import jax
import jax.numpy as jnp
from jax.experimental import pallas as pl
from jax.experimental.pallas import tpu as pltpu


def _round_up(a, m):
    return (a + m - 1) // m * m


# ----------------------------------------------------------------------------
# Pallas kernel: full Encoder forward for one batch tile per grid step.
# Four lane-dense MXU matmuls (3 conv-as-Toeplitz + fc), f32 accumulation.
# ----------------------------------------------------------------------------
def encoder_kernel(x_ref, w1_ref, b1_ref, w2_ref, b2_ref, w3_ref, b3_ref,
                   wfc_ref, bfc_ref, out_ref):

    def conv_relu(h, w_ref, b_ref):
        acc = jnp.dot(h.astype(w_ref.dtype), w_ref[...],
                      preferred_element_type=jnp.float32)
        return jnp.maximum(acc + b_ref[...], 0.0)      # bias/ReLU stay f32

    h = x_ref[...]                        # (BT, S*NC)
    h = conv_relu(h, w1_ref, b1_ref)      # (BT, n1)
    h = conv_relu(h, w2_ref, b2_ref)      # (BT, n2)
    h = conv_relu(h, w3_ref, b3_ref)      # (BT, n3)
    out = jnp.dot(h.astype(wfc_ref.dtype), wfc_ref[...],
                  preferred_element_type=jnp.float32) + bfc_ref[...]
    out_ref[...] = out                    # (BT, 2*latent) -- no lane padding


# ----------------------------------------------------------------------------
# Parameter preprocessing (one-time plain numpy glue).
# ----------------------------------------------------------------------------
def build_conv_toeplitz(w_oihw, h_in, w_in, k_pad, n_pad):
    """Torch conv weight (Cout, Cin, kh, kw) -> full block-Toeplitz matrix
    (k_pad, n_pad) mapping an HWC-flat input (h_in, w_in, Cin) image to an
    HWC-flat VALID-conv output (h_in-kh+1, w_in-kw+1, Cout). Zero padded."""
    w = np.asarray(w_oihw, np.float32)
    cout, cin, kh, kw = w.shape
    ho, wo = h_in - kh + 1, w_in - kw + 1
    m = np.zeros((k_pad, n_pad), np.float32)
    for p in range(kh):
        for q in range(kw):
            blk = w[:, :, p, q].T                       # (Cin, Cout)
            for r in range(ho):
                for c in range(wo):
                    kk = ((r + p) * w_in + (c + q)) * cin
                    nn = (r * wo + c) * cout
                    m[kk:kk + cin, nn:nn + cout] = blk
    return m


def build_conv_bias(b, ho, wo, n_pad):
    b = np.asarray(b, np.float32)
    out = np.zeros((1, n_pad), np.float32)
    out[0, :ho * wo * b.shape[0]] = np.tile(b, ho * wo)   # lane (r*wo+c)*Cout+o -> b[o]
    return out


def build_fc_weight(fcw, cout, wo, k_pad, n_out):
    """Torch fc weight (out, cout*wo) with torch flatten order c*wo + j ->
    kernel layout (k_pad, n_out) with contraction row index j*cout + c."""
    fcw = np.asarray(fcw, np.float32)
    out_dim = fcw.shape[0]
    k = fcw.reshape(out_dim, cout, wo).transpose(2, 1, 0).reshape(wo * cout, out_dim)
    m = np.zeros((k_pad, n_out), np.float32)
    m[:wo * cout, :] = k
    return m


# ----------------------------------------------------------------------------
# Wrapper
# ----------------------------------------------------------------------------
def encoder_forward(x, torch_params, latent_dim, *, batch_tile=1024, use_bf16=False):
    """x: (B, seq_size, embed_dim) float32; torch_params in PyTorch layouts."""
    cw1, cb1, cw2, cb2, cw3, cb3, fcw, fcb = torch_params
    B, S, NC = x.shape
    if S != 7:
        raise ValueError("Encoder is only shape-consistent for seq_size == 7")
    two_l = 2 * latent_dim

    # conv geometry of the VALID 3x3 stack on a (S, NC) single-channel image
    h1, w1o, c1 = S - 2, NC - 2, 4       # conv1 output
    h2, w2o, c2 = S - 4, NC - 4, 8       # conv2 output
    h3, w3o, c3 = S - 6, NC - 6, 16      # conv3 output (h3 == 1)

    k0 = S * NC                          # input lane dim (full-array block, no pad)
    n1 = _round_up(h1 * w1o * c1, 128)
    n2 = _round_up(h2 * w2o * c2, 128)
    n3 = _round_up(h3 * w3o * c3, 128)

    compute_dtype = jnp.bfloat16 if use_bf16 else jnp.float32

    W1 = jnp.asarray(build_conv_toeplitz(cw1, S, NC, k0, n1)).astype(compute_dtype)
    B1 = jnp.asarray(build_conv_bias(cb1, h1, w1o, n1))
    W2 = jnp.asarray(build_conv_toeplitz(cw2, h1, w1o, n1, n2)).astype(compute_dtype)
    B2 = jnp.asarray(build_conv_bias(cb2, h2, w2o, n2))
    W3 = jnp.asarray(build_conv_toeplitz(cw3, h2, w2o, n2, n3)).astype(compute_dtype)
    B3 = jnp.asarray(build_conv_bias(cb3, h3, w3o, n3))
    Wfc = jnp.asarray(build_fc_weight(fcw, c3, w3o, n3, two_l)).astype(compute_dtype)
    Bfc = jnp.asarray(np.asarray(fcb, np.float32).reshape(1, two_l))

    # --- batch tiling: BT multiple of 8, batch padded up to a multiple of BT.
    bt_cap = max(8, _round_up(batch_tile, 8))
    if 16 <= B <= bt_cap:
        # whole batch would fit in one tile: split so >=2 tiles exist and both
        # v7x TensorCores get work via the "parallel" grid axis.
        BT = _round_up(-(-B // 2), 8)
    else:
        BT = min(_round_up(B, 8), bt_cap)
    Bp = _round_up(B, BT)
    ntiles = Bp // BT

    # --- input layout: free contiguous reshape; pad batch only if needed.
    x2 = x.reshape(B, S * NC)
    if x2.dtype != compute_dtype:
        x2 = x2.astype(compute_dtype)
    if Bp != B:
        x2 = jnp.pad(x2, ((0, Bp - B), (0, 0)))

    # TODO(synk): weight/bias BlockSpecs could be single-buffered
    # (pipeline_mode=pl.Buffered(1)) since their index_map is constant; left at
    # the default to keep the lowering maximally portable.
    out = pl.pallas_call(
        encoder_kernel,
        out_shape=jax.ShapeDtypeStruct((Bp, two_l), jnp.float32),
        grid=(ntiles,),
        in_specs=[
            pl.BlockSpec((BT, S * NC), lambda i: (i, 0)),
            pl.BlockSpec(W1.shape, lambda i: (0, 0)),
            pl.BlockSpec(B1.shape, lambda i: (0, 0)),
            pl.BlockSpec(W2.shape, lambda i: (0, 0)),
            pl.BlockSpec(B2.shape, lambda i: (0, 0)),
            pl.BlockSpec(W3.shape, lambda i: (0, 0)),
            pl.BlockSpec(B3.shape, lambda i: (0, 0)),
            pl.BlockSpec(Wfc.shape, lambda i: (0, 0)),
            pl.BlockSpec(Bfc.shape, lambda i: (0, 0)),
        ],
        out_specs=pl.BlockSpec((BT, two_l), lambda i: (i, 0)),
        compiler_params=pltpu.CompilerParams(
            dimension_semantics=("parallel",)),
    )(x2, W1, B1, W2, B2, W3, B3, Wfc, Bfc)

    return out[:B] if Bp != B else out


# ----------------------------------------------------------------------------
# Pure-JAX reference (mirrors the PyTorch forward exactly) for validation.
# ----------------------------------------------------------------------------
def reference_forward(x, torch_params):
    cw1, cb1, cw2, cb2, cw3, cb3, fcw, fcb = torch_params
    B, S, NC = x.shape
    h = x.reshape(B, 1, S, NC)  # NCHW

    def conv(h, w, b):
        o = jax.lax.conv_general_dilated(
            h, w, window_strides=(1, 1), padding="VALID",
            dimension_numbers=("NCHW", "OIHW", "NCHW"),
            precision=jax.lax.Precision.HIGHEST)
        return jax.nn.relu(o + b[None, :, None, None])

    h = conv(h, cw1, cb1)
    h = conv(h, cw2, cb2)
    h = conv(h, cw3, cb3)
    h = h.reshape(B, -1)
    return jnp.dot(h, fcw.T, precision=jax.lax.Precision.HIGHEST) + fcb


# ----------------------------------------------------------------------------
if __name__ == "__main__":
    # Small shapes consistent with the module: seq_size must be 7 so the
    # flattened conv3 output matches fc's in_features.
    embed_dim = 16      # nc
    latent_dim = 8
    seq_size = 7
    batch = 20          # exercises multi-tile grid + batch padding
    nx = embed_dim - 6

    key = jax.random.PRNGKey(0)
    ks = jax.random.split(key, 9)
    params = (
        0.2 * jax.random.normal(ks[0], (4, 1, 3, 3), jnp.float32),    # conv1 w (OIHW)
        0.1 * jax.random.normal(ks[1], (4,), jnp.float32),            # conv1 b
        0.2 * jax.random.normal(ks[2], (8, 4, 3, 3), jnp.float32),    # conv2 w
        0.1 * jax.random.normal(ks[3], (8,), jnp.float32),            # conv2 b
        0.2 * jax.random.normal(ks[4], (16, 8, 3, 3), jnp.float32),   # conv3 w
        0.1 * jax.random.normal(ks[5], (16,), jnp.float32),           # conv3 b
        0.1 * jax.random.normal(ks[6], (2 * latent_dim, nx * 16), jnp.float32),  # fc w
        0.1 * jax.random.normal(ks[7], (2 * latent_dim,), jnp.float32),          # fc b
    )
    x = jax.random.normal(ks[8], (batch, seq_size, embed_dim), jnp.float32)

    # small batch_tile so the test runs multiple grid steps (tests index maps)
    out = encoder_forward(x, params, latent_dim, batch_tile=8, use_bf16=False)
    jax.block_until_ready(out)

    ref = reference_forward(x, params)
    np.testing.assert_allclose(np.asarray(out), np.asarray(ref), rtol=2e-3, atol=2e-3)

    print("KERNEL_OK")
</pallas_src>

<mosaic_0001>
module attributes {stable_mosaic.version = 11 : i64} {
  func.func @encoder_kernel(%arg0: i32, %arg1: memref<8x112xf32, #tpu.memory_space<vmem>>, %arg2: memref<112x384xf32, #tpu.memory_space<vmem>>, %arg3: memref<1x384xf32, #tpu.memory_space<vmem>>, %arg4: memref<384x384xf32, #tpu.memory_space<vmem>>, %arg5: memref<1x384xf32, #tpu.memory_space<vmem>>, %arg6: memref<384x256xf32, #tpu.memory_space<vmem>>, %arg7: memref<1x256xf32, #tpu.memory_space<vmem>>, %arg8: memref<256x16xf32, #tpu.memory_space<vmem>>, %arg9: memref<1x16xf32, #tpu.memory_space<vmem>>, %arg10: memref<8x16xf32, #tpu.memory_space<vmem>>) attributes {dimension_semantics = [#tpu.dimension_semantics<parallel>], iteration_bounds = array<i64: 3>, scalar_prefetch = 0 : i64, scratch_operands = 0 : i64, tpu.core_type = #tpu.core_type<tc>, window_params = [{transform_indices = @transform_0, window_bounds = array<i64: 8, 112>}, {pipeline_mode = #tpu.pipeline_mode<synchronous>, transform_indices = @transform_1, window_bounds = array<i64: 112, 384>}, {pipeline_mode = #tpu.pipeline_mode<synchronous>, transform_indices = @transform_2, window_bounds = array<i64: 1, 384>}, {pipeline_mode = #tpu.pipeline_mode<synchronous>, transform_indices = @transform_3, window_bounds = array<i64: 384, 384>}, {pipeline_mode = #tpu.pipeline_mode<synchronous>, transform_indices = @transform_4, window_bounds = array<i64: 1, 384>}, {pipeline_mode = #tpu.pipeline_mode<synchronous>, transform_indices = @transform_5, window_bounds = array<i64: 384, 256>}, {pipeline_mode = #tpu.pipeline_mode<synchronous>, transform_indices = @transform_6, window_bounds = array<i64: 1, 256>}, {pipeline_mode = #tpu.pipeline_mode<synchronous>, transform_indices = @transform_7, window_bounds = array<i64: 256, 16>}, {pipeline_mode = #tpu.pipeline_mode<synchronous>, transform_indices = @transform_8, window_bounds = array<i64: 1, 16>}, {transform_indices = @transform_9, window_bounds = array<i64: 8, 16>}]} {
    %c0 = arith.constant 0 : index
    %c0_0 = arith.constant 0 : index
    %0 = vector.load %arg1[%c0, %c0_0] : memref<8x112xf32, #tpu.memory_space<vmem>>, vector<8x112xf32>
    %c0_1 = arith.constant 0 : index
    %c0_2 = arith.constant 0 : index
    %1 = vector.load %arg2[%c0_1, %c0_2] : memref<112x384xf32, #tpu.memory_space<vmem>>, vector<112x384xf32>
    %cst = arith.constant dense<0.000000e+00> : vector<8x384xf32>
    %2 = tpu.matmul %0, %1, %cst {dimension_numbers = #tpu.dot_dimension_numbers<[1], [0], [0], [1], [0, 0, 1, 1], [], []>} : vector<8x112xf32>, vector<112x384xf32>, vector<8x384xf32> -> vector<8x384xf32>
    %c0_3 = arith.constant 0 : index
    %c0_4 = arith.constant 0 : index
    %3 = vector.load %arg3[%c0_3, %c0_4] : memref<1x384xf32, #tpu.memory_space<vmem>>, vector<1x384xf32>
    %4 = vector.broadcast %3 : vector<1x384xf32> to vector<8x384xf32>
    %5 = arith.addf %2, %4 : vector<8x384xf32>
    %cst_5 = arith.constant 0.000000e+00 : f32
    %6 = vector.broadcast %cst_5 : f32 to vector<8x384xf32>
    %7 = arith.maximumf %5, %6 : vector<8x384xf32>
    %c0_6 = arith.constant 0 : index
    %c0_7 = arith.constant 0 : index
    %8 = vector.load %arg4[%c0_6, %c0_7] : memref<384x384xf32, #tpu.memory_space<vmem>>, vector<384x384xf32>
    %cst_8 = arith.constant dense<0.000000e+00> : vector<8x384xf32>
    %9 = tpu.matmul %7, %8, %cst_8 {dimension_numbers = #tpu.dot_dimension_numbers<[1], [0], [0], [1], [0, 0, 1, 1], [], []>} : vector<8x384xf32>, vector<384x384xf32>, vector<8x384xf32> -> vector<8x384xf32>
    %c0_9 = arith.constant 0 : index
    %c0_10 = arith.constant 0 : index
    %10 = vector.load %arg5[%c0_9, %c0_10] : memref<1x384xf32, #tpu.memory_space<vmem>>, vector<1x384xf32>
    %11 = vector.broadcast %10 : vector<1x384xf32> to vector<8x384xf32>
    %12 = arith.addf %9, %11 : vector<8x384xf32>
    %cst_11 = arith.constant 0.000000e+00 : f32
    %13 = vector.broadcast %cst_11 : f32 to vector<8x384xf32>
    %14 = arith.maximumf %12, %13 : vector<8x384xf32>
    %c0_12 = arith.constant 0 : index
    %c0_13 = arith.constant 0 : index
    %15 = vector.load %arg6[%c0_12, %c0_13] : memref<384x256xf32, #tpu.memory_space<vmem>>, vector<384x256xf32>
    %cst_14 = arith.constant dense<0.000000e+00> : vector<8x256xf32>
    %16 = tpu.matmul %14, %15, %cst_14 {dimension_numbers = #tpu.dot_dimension_numbers<[1], [0], [0], [1], [0, 0, 1, 1], [], []>} : vector<8x384xf32>, vector<384x256xf32>, vector<8x256xf32> -> vector<8x256xf32>
    %c0_15 = arith.constant 0 : index
    %c0_16 = arith.constant 0 : index
    %17 = vector.load %arg7[%c0_15, %c0_16] : memref<1x256xf32, #tpu.memory_space<vmem>>, vector<1x256xf32>
    %18 = vector.broadcast %17 : vector<1x256xf32> to vector<8x256xf32>
    %19 = arith.addf %16, %18 : vector<8x256xf32>
    %cst_17 = arith.constant 0.000000e+00 : f32
    %20 = vector.broadcast %cst_17 : f32 to vector<8x256xf32>
    %21 = arith.maximumf %19, %20 : vector<8x256xf32>
    %c0_18 = arith.constant 0 : index
    %c0_19 = arith.constant 0 : index
    %22 = vector.load %arg8[%c0_18, %c0_19] : memref<256x16xf32, #tpu.memory_space<vmem>>, vector<256x16xf32>
    %cst_20 = arith.constant dense<0.000000e+00> : vector<8x16xf32>
    %23 = tpu.matmul %21, %22, %cst_20 {dimension_numbers = #tpu.dot_dimension_numbers<[1], [0], [0], [1], [0, 0, 1, 1], [], []>} : vector<8x256xf32>, vector<256x16xf32>, vector<8x16xf32> -> vector<8x16xf32>
    %c0_21 = arith.constant 0 : index
    %c0_22 = arith.constant 0 : index
    %24 = vector.load %arg9[%c0_21, %c0_22] : memref<1x16xf32, #tpu.memory_space<vmem>>, vector<1x16xf32>
    %25 = vector.broadcast %24 : vector<1x16xf32> to vector<8x16xf32>
    %26 = arith.addf %23, %25 : vector<8x16xf32>
    %c0_23 = arith.constant 0 : index
    %c0_24 = arith.constant 0 : index
    %27 = vector.load %arg10[%c0_23, %c0_24] : memref<8x16xf32, #tpu.memory_space<vmem>>, vector<8x16xf32>
    tpu.vector_store %arg10[%c0_23, %c0_24], %26 {strides = array<i32>} : memref<8x16xf32, #tpu.memory_space<vmem>>, vector<8x16xf32>,
    return
  }
  func.func @transform_0(%arg0: i32) -> (i32, i32) {
    %c0_i32 = arith.constant 0 : i32
    %c0_i32_0 = arith.constant 0 : i32
    return %arg0, %c0_i32 : i32, i32
  }
  func.func @transform_1(%arg0: i32) -> (i32, i32) {
    %c0_i32 = arith.constant 0 : i32
    %c0_i32_0 = arith.constant 0 : i32
    %c0_i32_1 = arith.constant 0 : i32
    return %c0_i32, %c0_i32_0 : i32, i32
  }
  func.func @transform_2(%arg0: i32) -> (i32, i32) {
    %c0_i32 = arith.constant 0 : i32
    %c0_i32_0 = arith.constant 0 : i32
    %c0_i32_1 = arith.constant 0 : i32
    return %c0_i32, %c0_i32_0 : i32, i32
  }
  func.func @transform_3(%arg0: i32) -> (i32, i32) {
    %c0_i32 = arith.constant 0 : i32
    %c0_i32_0 = arith.constant 0 : i32
    %c0_i32_1 = arith.constant 0 : i32
    return %c0_i32, %c0_i32_0 : i32, i32
  }
  func.func @transform_4(%arg0: i32) -> (i32, i32) {
    %c0_i32 = arith.constant 0 : i32
    %c0_i32_0 = arith.constant 0 : i32
    %c0_i32_1 = arith.constant 0 : i32
    return %c0_i32, %c0_i32_0 : i32, i32
  }
  func.func @transform_5(%arg0: i32) -> (i32, i32) {
    %c0_i32 = arith.constant 0 : i32
    %c0_i32_0 = arith.constant 0 : i32
    %c0_i32_1 = arith.constant 0 : i32
    return %c0_i32, %c0_i32_0 : i32, i32
  }
  func.func @transform_6(%arg0: i32) -> (i32, i32) {
    %c0_i32 = arith.constant 0 : i32
    %c0_i32_0 = arith.constant 0 : i32
    %c0_i32_1 = arith.constant 0 : i32
    return %c0_i32, %c0_i32_0 : i32, i32
  }
  func.func @transform_7(%arg0: i32) -> (i32, i32) {
    %c0_i32 = arith.constant 0 : i32
    %c0_i32_0 = arith.constant 0 : i32
    %c0_i32_1 = arith.constant 0 : i32
    return %c0_i32, %c0_i32_0 : i32, i32
  }
  func.func @transform_8(%arg0: i32) -> (i32, i32) {
    %c0_i32 = arith.constant 0 : i32
    %c0_i32_0 = arith.constant 0 : i32
    %c0_i32_1 = arith.constant 0 : i32
    return %c0_i32, %c0_i32_0 : i32, i32
  }
  func.func @transform_9(%arg0: i32) -> (i32, i32) {
    %c0_i32 = arith.constant 0 : i32
    %c0_i32_0 = arith.constant 0 : i32
    return %arg0, %c0_i32 : i32, i32
  }
}

</mosaic_0001>

<bundles_post_ra>
// kernel: tpu_custom_call.1
= control target key start
LH: loop header
LB: loop body
LE: loop exit
PB: predicated region body
PF: predicated region fallthrough
CT: control target
= control target key end

     0   :  { %14 = vsyncpa [#allocation3], 0  ;;  %s2127_s0 = inlined_call_operand.vmem [shape: f32[24,112], index: 0, kind: input, shape index: {}]   ;;  %s2128_s1 = inlined_call_operand.hbm [shape: f32[112,384], index: 1, kind: input, shape index: {}]   ;;  %s2129_s2 = inlined_call_operand.vmem [shape: f32[1,384], index: 2, kind: input, shape index: {}]   ;;  %s2130_s3 = inlined_call_operand.hbm [shape: f32[384,384], index: 3, kind: input, shape index: {}]   ;;  %s2131_s4 = inlined_call_operand.vmem [shape: f32[1,384], index: 4, kind: input, shape index: {}]   ;;  %s2132_s5 = inlined_call_operand.hbm [shape: f32[384,256], index: 5, kind: input, shape index: {}]   ;;  %s2133_s6 = inlined_call_operand.vmem [shape: f32[1,256], index: 6, kind: input, shape index: {}]   ;;  %s2134_s7 = inlined_call_operand.vmem [shape: f32[256,16], index: 7, kind: input, shape index: {}]   ;;  %s2135_s8 = inlined_call_operand.vmem [shape: f32[1,16], index: 8, kind: input, shape index: {}]   ;;  %s2136_s9 = inlined_call_operand.vmem [shape: f32[24,16], index: 9, kind: output, shape index: {}]  }
   0x1   :  { %15 = vsyncpa [#allocation5], 0  ;;  %s1857_s30 = smov 0  }
   0x2 LB: > { %s1863_s10 = sadd.s32 4294967295, %s1796_s30   ;;  %p1475_p0 = scmp.ge.s32.totalorder %s1796_s30, 1  ;;  %s1796_s30 = sphi %s1857_s30, %s21_s30  }
   0x3   : > { %p246_p1 = scmp.lt.s32.totalorder %s1796_s30, 4  ;;  %p1681_p2 = scmp.eq.s32.totalorder %s1863_s10, 0 }
   0x4   : > { %s1798_s12 = smov [#allocation4]   ;;  %s1799_s14 = smov [#allocation2]  }
   0x5   : > { %p1868_p3 = pnand %p1475_p0, %p246_p1  ;;  %s274_s13 = sshll.u32 %s1798_s12, 4  ;;  %s275_s13 = int_to_ptr.vmem [resolvable:$true] %s274_s13 }
   0x6   : > { %s258_s15 = sshll.u32 %s1799_s14, 4  ;;  %s1800_s17 = smov [#allocation6]   ;;  %s1874_s15 = int_to_ptr.vmem [resolvable:$true] %s258_s15 }
   0x7   : > { %p1671_p4 = pneg %p1868_p3  ;;  %s290_s18 = sshll.u32 %s1800_s17, 4  ;;  %s1882_s18 = int_to_ptr.vmem [resolvable:$true] %s290_s18 }
   0x8   : > { %s1715_s19 = scalar_lea.vmem %s275_s13, 18432  ;;  %p1723_p10 = scmp.lt.s32.totalorder %s275_s13, %s275_s13 }
   0x9   : > { %p1878_p5 = pnand %p1681_p2, %p1671_p4  ;;  %p1716_p7 = scmp.ne.s32.totalorder %s275_s13, %s1715_s19 }
   0xa   : > { %p1724_p11 = scmp.lt.s32.totalorder %s1715_s19, %s1715_s19 }
   0xb   : > { %p1706_p6 = pneg %p1878_p5 }
   0xc   : > { %p1725_p12 = por %p1724_p11, %p1723_p10 }
   0xd   : > { %p1718_p8 = pnand %p1716_p7, %p1706_p6 }
   0xf   : > { %p1719_p9 = pneg %p1718_p8 }
  0x11   : > { %p1726_p13 = pnand %p1725_p12, %p1719_p9 }
  0x13   : > { %1729 = shalt.err (!%p1726_p13)
}
  0x14   : > { %s1801_s20 = smov 384   ;;  %s1802_s21 = smov 24  }
  0x15   : > { %1677 = dma.hbm_to_vmem [thread:$0]  (!%p1878_p5), %s2130_s3, 18432, %s275_s13, [#allocation5], %s1801_s20, %s1801_s20, %s1802_s21  }
  0x16   : > { %s1741_s24 = scalar_lea.vmem %s1874_s15, 5376  ;;  %p1749_p7 = scmp.lt.s32.totalorder %s1874_s15, %s1874_s15 }
  0x17   : > { %p1742_p0 = scmp.ne.s32.totalorder %s1874_s15, %s1741_s24  ;;  %p1750_p8 = scmp.lt.s32.totalorder %s1741_s24, %s1741_s24 }
  0x19   : > { %p1744_p1 = pnand %p1742_p0, %p1706_p6  ;;  %p1751_p9 = por %p1750_p8, %p1749_p7 }
  0x1b   : > { %p1745_p4 = pneg %p1744_p1 }
  0x1d   : > { %p1752_p10 = pnand %p1751_p9, %p1745_p4 }
  0x1f   : > { %1755 = shalt.err (!%p1752_p10)
}
  0x20   : > { %1674 = dma.hbm_to_vmem [thread:$0]  (!%p1878_p5), %s2128_s1, 5376, %s1874_s15, [#allocation3], %s1801_s20, %s1801_s20, %s1802_s21  }
  0x21   : > { %s1767_s27 = scalar_lea.vmem %s1882_s18, 12288  ;;  %p1775_p0 = scmp.lt.s32.totalorder %s1882_s18, %s1882_s18 }
  0x22   : > { %p1768_p11 = scmp.ne.s32.totalorder %s1882_s18, %s1767_s27  ;;  %p1776_p1 = scmp.lt.s32.totalorder %s1767_s27, %s1767_s27 }
  0x24   : > { %p1770_p12 = pnand %p1768_p11, %p1706_p6  ;;  %p1777_p4 = por %p1776_p1, %p1775_p0 }
  0x26   : > { %p1771_p13 = pneg %p1770_p12 }
  0x28   : > { %p1778_p7 = pnand %p1777_p4, %p1771_p13 }
  0x2a   : > { %1781 = shalt.err (!%p1778_p7)
}
  0x2b   : > { %s1803_s28 = smov 256   ;;  %s1804_s29 = smov 16  }
  0x2c   : > { %1680 = dma.hbm_to_vmem [thread:$0]  (!%p1878_p5), %s2132_s5, 12288, %s1882_s18, [#allocation5], %s1803_s28, %s1803_s28, %s1804_s29  }
  0x2d   : > { %322 = sbr.rel (%p1868_p3) target bundleno = 942 (0x3ae), region = 56 }
  0x32   : > { %1787 = dma.done.wait (%p1681_p2), [#allocation3], 5376  }
  0x33   : > { %1789 = vsyncadd (%p1681_p2), [#allocation3], 4294961920 }
  0x34   : > { %1791 = dma.done.wait (%p1681_p2), [#allocation5], 30720  }
  0x35   : > { %1793 = vsyncadd (%p1681_p2), [#allocation5], 4294936576  ;;  %v1805_v0 = vmov 0.0   ;;  %v413_v1 = vld [vmem:[#allocation2 + $0x140] sm:$0xff]  ;;  %v412_v2 = vld [vmem:[#allocation2 + $0x138] sm:$0xff]  ;;  %p364_p2 = scmp.lt.s32.totalorder %s1863_s10, 2 }
  0x36   : > { %500 = vmatprep.mubr.f32.mxu1 %v1805_v0  ;;  %v410_v3 = vld [vmem:[#allocation2 + $0x128] sm:$0xff]  ;;  %440 = vmatprep.subr.mxu1 %v413_v1  ;;  %v409_v4 = vld [vmem:[#allocation2 + $0x120] sm:$0xff]  ;;  %v407_v5 = vld [vmem:[#allocation2 + $0x110] sm:$0xff]  ;;  %vm432_vm0 = vcmask 916480   ;;  %vm1806_vm1 = vmmov 0   ;;  %vm1387_vm2 = vcmask 130048  }
  0x37   : > { %441 = vmatpush1.msra.mxu1 %v412_v2  ;;  %v406_v6 = vld [vmem:[#allocation2 + $0x108] sm:$0xff]  ;;  %v404_v7 = vld [vmem:[#allocation2 + $0xf8] sm:$0xff]  ;;  %v403_v8 = vld [vmem:[#allocation2 + $0xf0] sm:$0xff]  ;;  %s2140_s10 = smov (!%p364_p2, %s1863_s10), 2 }
  0x38   : > { %442 = vmatprep.subr.mxu1 %v410_v3  ;;  %v401_v9 = vld [vmem:[#allocation2 + $0xe0] sm:$0xff]  ;;  %v400_v10 = vld [vmem:[#allocation2 + $0xd8] sm:$0xff]  ;;  %v398_v11 = vld [vmem:[#allocation2 + $0xc8] sm:$0xff]  ;;  %s1484_s11 = sshll.u32 %s2140_s10, 3 }
  0x39   : > { %443 = vmatpush1.msra.mxu1 %v409_v4  ;;  %v397_v12 = vld [vmem:[#allocation2 + $0xc0] sm:$0xff]  ;;  %v395_v13 = vld [vmem:[#allocation2 + $0xb0] sm:$0xff]  ;;  %v394_v14 = vld [vmem:[#allocation2 + $0xa8] sm:$0xff]  ;;  %s367_s16 = scalar_lea.vmem %s2127_s0, %s1484_s11  ;;  %s371_s19 = scalar_lea.vmem %s2136_s9, %s1484_s11 }
  0x3a   : > { %444 = vmatprep.subr.mxu1 %v407_v5  ;;  %v392_v15 = vld [vmem:[#allocation2 + $0x98] sm:$0xff]  ;;  %v391_v16 = vld [vmem:[#allocation2 + $0x90] sm:$0xff]  ;;  %v389_v17 = vld [vmem:[#allocation2 + $0x80] sm:$0xff] }
  0x3b   : > { %445 = vmatpush1.msra.mxu1 %v406_v6  ;;  %v626_v18 = vld [vmem:[#allocation4 + $0x170] sm:$0xff]  ;;  %v625_v19 = vld [vmem:[#allocation4 + $0x168] sm:$0xff]  ;;  %v623_v21 = vld [vmem:[#allocation4 + $0x158] sm:$0xff] }
  0x3c   : > { %446 = vmatprep.subr.mxu1 %v404_v7  ;;  %v388_v20 = vld [vmem:[#allocation2 + $0x78] sm:$0xff]  ;;  %741 = vmatprep.subr.mxu0 %v626_v18  ;;  %v622_v22 = vld [vmem:[#allocation4 + $0x150] sm:$0xff]  ;;  %v386_v23 = vld [vmem:[#allocation2 + $0x68] sm:$0xff] }
  0x3d   : > { %447 = vmatpush1.msra.mxu1 %v403_v8  ;;  %742 = vmatpush1.msra.mxu0 %v625_v19  ;;  %v620_v24 = vld [vmem:[#allocation4 + $0x140] sm:$0xff]  ;;  %v385_v25 = vld [vmem:[#allocation2 + $0x60] sm:$0xff]  ;;  %v619_v26 = vld [vmem:[#allocation4 + $0x138] sm:$0xff] }
  0x3e   : > { %448 = vmatprep.subr.mxu1 %v401_v9  ;;  %743 = vmatprep.subr.mxu0 %v623_v21  ;;  %v383_v27 = vld [vmem:[#allocation2 + $0x50] sm:$0xff]  ;;  %v617_v28 = vld [vmem:[#allocation4 + $0x128] sm:$0xff]  ;;  %v382_v29 = vld [vmem:[#allocation2 + $0x48] sm:$0xff] }
  0x3f   : > { %449 = vmatpush1.msra.mxu1 %v400_v10  ;;  %744 = vmatpush1.msra.mxu0 %v622_v22  ;;  %v616_v30 = vld [vmem:[#allocation4 + $0x120] sm:$0xff]  ;;  %v380_v31 = vld [vmem:[#allocation2 + $0x38] sm:$0xff]  ;;  %v614_v32 = vld [vmem:[#allocation4 + $0x110] sm:$0xff] }
  0x40   : > { %450 = vmatprep.subr.mxu1 %v398_v11  ;;  %745 = vmatprep.subr.mxu0 %v620_v24  ;;  %v379_v33 = vld [vmem:[#allocation2 + $0x30] sm:$0xff]  ;;  %v613_v34 = vld [vmem:[#allocation4 + $0x108] sm:$0xff]  ;;  %v377_v35 = vld [vmem:[#allocation2 + $0x20] sm:$0xff] }
  0x41   : > { %451 = vmatpush1.msra.mxu1 %v397_v12  ;;  %746 = vmatpush1.msra.mxu0 %v619_v26  ;;  %v611_v36 = vld [vmem:[#allocation4 + $0xf8] sm:$0xff]  ;;  %v376_v37 = vld [vmem:[#allocation2 + $0x18] sm:$0xff]  ;;  %v610_v38 = vld [vmem:[#allocation4 + $0xf0] sm:$0xff] }
  0x42   : > { %452 = vmatprep.subr.mxu1 %v395_v13  ;;  %747 = vmatprep.subr.mxu0 %v617_v28  ;;  %v374_v39 = vld [vmem:[#allocation2 + $0x8] sm:$0xff]  ;;  %v608_v40 = vld [vmem:[#allocation4 + $0xe0] sm:$0xff]  ;;  %v373_v41 = vld [vmem:[#allocation2] sm:$0xff] }
  0x43   : > { %453 = vmatpush1.msra.mxu1 %v394_v14  ;;  %748 = vmatpush1.msra.mxu0 %v616_v30  ;;  %v607_v42 = vld [vmem:[#allocation4 + $0xd8] sm:$0xff]  ;;  %v1943_v43 = vld [vmem:[%s367_s16] sm:$0xff]  ;;  %v605_v45 = vld [vmem:[#allocation4 + $0xc8] sm:$0xff] }
  0x44   : > { %454 = vmatprep.subr.mxu1 %v392_v15  ;;  %749 = vmatprep.subr.mxu0 %v614_v32  ;;  %v414_v44 = vld [vmem:[#allocation2 + $0x148] sm:$0xff]  ;;  %v411_v46 = vld [vmem:[#allocation2 + $0x130] sm:$0xff]  ;;  %v602_v48 = vld [vmem:[#allocation4 + $0xb0] sm:$0xff] }
  0x45   : > { %455 = vmatpush1.msra.mxu1 %v391_v16  ;;  %750 = vmatpush1.msra.mxu0 %v613_v34  ;;  %v604_v47 = vld [vmem:[#allocation4 + $0xc0] sm:$0xff]  ;;  %v408_v49 = vld [vmem:[#allocation2 + $0x118] sm:$0xff]  ;;  %v599_v51 = vld [vmem:[#allocation4 + $0x98] sm:$0xff] }
  0x46   : > { %456 = vmatprep.subr.mxu1 %v389_v17  ;;  %751 = vmatprep.subr.mxu0 %v611_v36  ;;  %v601_v50 = vld [vmem:[#allocation4 + $0xa8] sm:$0xff]  ;;  %v405_v52 = vld [vmem:[#allocation2 + $0x100] sm:$0xff]  ;;  %v596_v54 = vld [vmem:[#allocation4 + $0x80] sm:$0xff] }
  0x47   : > { %457 = vmatpush1.msra.mxu1 %v388_v20  ;;  %752 = vmatpush1.msra.mxu0 %v610_v38  ;;  %v598_v53 = vld [vmem:[#allocation4 + $0x90] sm:$0xff]  ;;  %v402_v55 = vld [vmem:[#allocation2 + $0xe8] sm:$0xff]  ;;  %v593_v57 = vld [vmem:[#allocation4 + $0x68] sm:$0xff] }
  0x48   : > { %458 = vmatprep.subr.mxu1 %v386_v23  ;;  %753 = vmatprep.subr.mxu0 %v608_v40  ;;  %v595_v56 = vld [vmem:[#allocation4 + $0x78] sm:$0xff]  ;;  %v399_v58 = vld [vmem:[#allocation2 + $0xd0] sm:$0xff]  ;;  %v590_v60 = vld [vmem:[#allocation4 + $0x50] sm:$0xff] }
  0x49   : > { %459 = vmatpush1.msra.mxu1 %v385_v25  ;;  %754 = vmatpush1.msra.mxu0 %v607_v42  ;;  %v592_v59 = vld [vmem:[#allocation4 + $0x60] sm:$0xff]  ;;  %v396_v61 = vld [vmem:[#allocation2 + $0xb8] sm:$0xff]  ;;  %v587_v63 = vld [vmem:[#allocation4 + $0x38] sm:$0xff] }
  0x4a   : > { %460 = vmatprep.subr.mxu1 %v383_v27  ;;  %755 = vmatprep.subr.mxu0 %v605_v45  ;;  %v589_v62 = vld [vmem:[#allocation4 + $0x48] sm:$0xff]  ;;  %v393_v1 = vld [vmem:[#allocation2 + $0xa0] sm:$0xff]  ;;  %v584_v3 = vld [vmem:[#allocation4 + $0x20] sm:$0xff] }
  0x4b   : > { %461 = vmatpush1.msra.mxu1 %v382_v29  ;;  %756 = vmatpush1.msra.mxu0 %v604_v47  ;;  %v586_v2 = vld [vmem:[#allocation4 + $0x30] sm:$0xff]  ;;  %v390_v4 = vld [vmem:[#allocation2 + $0x88] sm:$0xff]  ;;  %v581_v6 = vld [vmem:[#allocation4 + $0x8] sm:$0xff] }
  0x4c   : > { %462 = vmatprep.subr.mxu1 %v380_v31  ;;  %757 = vmatprep.subr.mxu0 %v602_v48  ;;  %v583_v5 = vld [vmem:[#allocation4 + $0x18] sm:$0xff]  ;;  %v387_v7 = vld [vmem:[#allocation2 + $0x70] sm:$0xff]  ;;  %v674_v9 = vld [vmem:[#allocation4 + $0x2f0] sm:$0xff] }
  0x4d   : > { %463 = vmatpush1.msra.mxu1 %v379_v33  ;;  %758 = vmatpush1.msra.mxu0 %v601_v50  ;;  %v580_v8 = vld [vmem:[#allocation4] sm:$0xff]  ;;  %v384_v10 = vld [vmem:[#allocation2 + $0x58] sm:$0xff]  ;;  %v671_v12 = vld [vmem:[#allocation4 + $0x2d8] sm:$0xff] }
  0x4e   : > { %464 = vmatprep.subr.mxu1 %v377_v35  ;;  %759 = vmatprep.subr.mxu0 %v599_v51  ;;  %v673_v11 = vld [vmem:[#allocation4 + $0x2e8] sm:$0xff]  ;;  %v381_v13 = vld [vmem:[#allocation2 + $0x40] sm:$0xff]  ;;  %v668_v15 = vld [vmem:[#allocation4 + $0x2c0] sm:$0xff] }
  0x4f   : > { %465 = vmatpush1.msra.mxu1 %v376_v37  ;;  %760 = vmatpush1.msra.mxu0 %v598_v53  ;;  %v670_v14 = vld [vmem:[#allocation4 + $0x2d0] sm:$0xff]  ;;  %v378_v16 = vld [vmem:[#allocation2 + $0x28] sm:$0xff]  ;;  %v665_v18 = vld [vmem:[#allocation4 + $0x2a8] sm:$0xff] }
  0x50   : > { %466 = vmatprep.subr.mxu1 %v374_v39  ;;  %761 = vmatprep.subr.mxu0 %v596_v54  ;;  %v667_v17 = vld [vmem:[#allocation4 + $0x2b8] sm:$0xff]  ;;  %v375_v19 = vld [vmem:[#allocation2 + $0x10] sm:$0xff]  ;;  %v662_v21 = vld [vmem:[#allocation4 + $0x290] sm:$0xff] }
  0x51   : > { %467 = vmatpush1.msra.mxu1 %v373_v41  ;;  %762 = vmatpush1.msra.mxu0 %v595_v56  ;;  %v664_v20 = vld [vmem:[#allocation4 + $0x2a0] sm:$0xff]  ;;  %v661_v22 = vld [vmem:[#allocation4 + $0x288] sm:$0xff]  ;;  %v659_v23 = vld [vmem:[#allocation4 + $0x278] sm:$0xff] }
  0x52   : > { %1486 = vmatmul.mubr.msk.f32.vlgmr.msra.gmra.mxu1 %vm432_vm0, %v1943_v43  ;;  %1593 = vmatprep.subr.mxu1 %v1805_v0  ;;  %v658_v24 = vld [vmem:[#allocation4 + $0x270] sm:$0xff]  ;;  %v656_v25 = vld [vmem:[#allocation4 + $0x260] sm:$0xff]  ;;  %v655_v26 = vld [vmem:[#allocation4 + $0x258] sm:$0xff] }
  0x53   : > { %1594 = vmatpush3.msra.mxu1 %v414_v44  ;;  %1621 = vmatprep.mubr.msk.f32.mxu1 %vm1806_vm1, %v1805_v0  ;;  %v653_v27 = vld [vmem:[#allocation4 + $0x248] sm:$0xff]  ;;  %v652_v28 = vld [vmem:[#allocation4 + $0x240] sm:$0xff]  ;;  %v650_v29 = vld [vmem:[#allocation4 + $0x230] sm:$0xff] }
  0x54   : > { %1595 = vmatprep.subr.mxu1 %v1805_v0  ;;  %763 = vmatprep.subr.mxu0 %v593_v57  ;;  %v649_v30 = vld [vmem:[#allocation4 + $0x228] sm:$0xff]  ;;  %v647_v31 = vld [vmem:[#allocation4 + $0x218] sm:$0xff]  ;;  %v646_v32 = vld [vmem:[#allocation4 + $0x210] sm:$0xff] }
  0x55   : > { %1596 = vmatpush3.msra.mxu1 %v411_v46  ;;  %764 = vmatpush1.msra.mxu0 %v592_v59  ;;  %v644_v33 = vld [vmem:[#allocation4 + $0x200] sm:$0xff]  ;;  %v643_v34 = vld [vmem:[#allocation4 + $0x1f8] sm:$0xff]  ;;  %v641_v35 = vld [vmem:[#allocation4 + $0x1e8] sm:$0xff] }
  0x56   : > { %1597 = vmatprep.subr.mxu1 %v1805_v0  ;;  %765 = vmatprep.subr.mxu0 %v590_v60  ;;  %v640_v36 = vld [vmem:[#allocation4 + $0x1e0] sm:$0xff]  ;;  %v638_v37 = vld [vmem:[#allocation4 + $0x1d0] sm:$0xff]  ;;  %v637_v38 = vld [vmem:[#allocation4 + $0x1c8] sm:$0xff] }
  0x57   : > { %1598 = vmatpush3.msra.mxu1 %v408_v49  ;;  %766 = vmatpush1.msra.mxu0 %v589_v62  ;;  %v722_v39 = vld [vmem:[#allocation4 + $0x470] sm:$0xff]  ;;  %v635_v40 = vld [vmem:[#allocation4 + $0x1b8] sm:$0xff]  ;;  %v721_v41 = vld [vmem:[#allocation4 + $0x468] sm:$0xff] }
  0x58   : > { %1599 = vmatprep.subr.mxu1 %v1805_v0  ;;  %767 = vmatprep.subr.mxu0 %v587_v63  ;;  %v634_v42 = vld [vmem:[#allocation4 + $0x1b0] sm:$0xff]  ;;  %v632_v44 = vld [vmem:[#allocation4 + $0x1a0] sm:$0xff]  ;;  %v631_v46 = vld [vmem:[#allocation4 + $0x198] sm:$0xff] }
  0x59   : > { %1600 = vmatpush3.msra.mxu1 %v405_v52  ;;  %768 = vmatpush1.msra.mxu0 %v586_v2  ;;  %v718_v45 = vld [vmem:[#allocation4 + $0x450] sm:$0xff]  ;;  %v716_v47 = vld [vmem:[#allocation4 + $0x440] sm:$0xff]  ;;  %v629_v48 = vld [vmem:[#allocation4 + $0x188] sm:$0xff] }
  0x5a   : > { %1601 = vmatprep.subr.mxu1 %v1805_v0  ;;  %769 = vmatprep.subr.mxu0 %v584_v3  ;;  %v715_v49 = vld [vmem:[#allocation4 + $0x438] sm:$0xff]  ;;  %v628_v50 = vld [vmem:[#allocation4 + $0x180] sm:$0xff]  ;;  %v713_v51 = vld [vmem:[#allocation4 + $0x428] sm:$0xff] }
  0x5b   : > { %1602 = vmatpush3.msra.mxu1 %v402_v55  ;;  %770 = vmatpush1.msra.mxu0 %v583_v5  ;;  %v712_v52 = vld [vmem:[#allocation4 + $0x420] sm:$0xff]  ;;  %v710_v53 = vld [vmem:[#allocation4 + $0x410] sm:$0xff]  ;;  %v709_v54 = vld [vmem:[#allocation4 + $0x408] sm:$0xff] }
  0x5c   : > { %1603 = vmatprep.subr.mxu1 %v1805_v0  ;;  %771 = vmatprep.subr.mxu0 %v581_v6  ;;  %v707_v55 = vld [vmem:[#allocation4 + $0x3f8] sm:$0xff]  ;;  %v706_v56 = vld [vmem:[#allocation4 + $0x3f0] sm:$0xff]  ;;  %v704_v57 = vld [vmem:[#allocation4 + $0x3e0] sm:$0xff] }
  0x5d   : > { %1604 = vmatpush3.msra.mxu1 %v399_v58  ;;  %772 = vmatpush1.msra.mxu0 %v580_v8  ;;  %v703_v58 = vld [vmem:[#allocation4 + $0x3d8] sm:$0xff]  ;;  %v701_v59 = vld [vmem:[#allocation4 + $0x3c8] sm:$0xff]  ;;  %v700_v60 = vld [vmem:[#allocation4 + $0x3c0] sm:$0xff] }
  0x5e   : > { %1605 = vmatprep.subr.mxu1 %v1805_v0  ;;  %773 = vmatprep.subr.mxu0 %v674_v9  ;;  %v697_v62 = vld [vmem:[#allocation4 + $0x3a8] sm:$0xff]  ;;  %v695_v63 = vld [vmem:[#allocation4 + $0x398] sm:$0xff]  ;;  %v692_v2 = vld [vmem:[#allocation4 + $0x380] sm:$0xff] }
  0x5f   : > { %1606 = vmatpush3.msra.mxu1 %v396_v61  ;;  %774 = vmatpush2.msra.mxu0 %v673_v11  ;;  %v698_v61 = vld [vmem:[#allocation4 + $0x3b0] sm:$0xff]  ;;  %v691_v3 = vld [vmem:[#allocation4 + $0x378] sm:$0xff]  ;;  %v688_v5 = vld [vmem:[#allocation4 + $0x360] sm:$0xff] }
  0x60   : > { %1607 = vmatprep.subr.mxu1 %v1805_v0  ;;  %775 = vmatprep.subr.mxu0 %v671_v12  ;;  %v686_v6 = vld [vmem:[#allocation4 + $0x350] sm:$0xff]  ;;  %v683_v8 = vld [vmem:[#allocation4 + $0x338] sm:$0xff]  ;;  %v677_v12 = vld [vmem:[#allocation4 + $0x308] sm:$0xff] }
  0x61   : > { %1608 = vmatpush3.msra.mxu1 %v393_v1  ;;  %776 = vmatpush2.msra.mxu0 %v670_v14  ;;  %v694_v1 = vld [vmem:[#allocation4 + $0x390] sm:$0xff]  ;;  %v679_v11 = vld [vmem:[#allocation4 + $0x318] sm:$0xff] }
  0x62   : > { %1609 = vmatprep.subr.mxu1 %v1805_v0  ;;  %777 = vmatprep.subr.mxu0 %v668_v15  ;;  %v682_v9 = vld [vmem:[#allocation4 + $0x330] sm:$0xff]  ;;  %v675_v14 = vld [vmem:[#allocation4 + $0x2f8] sm:$0xff]  ;;  %v417_v15 = vlaneseq }
  0x63   : > { %1610 = vmatpush3.msra.mxu1 %v390_v4  ;;  %778 = vmatpush2.msra.mxu0 %v667_v17  ;;  %v689_v4 = vld [vmem:[#allocation4 + $0x368] sm:$0xff] }
  0x64   : > { %1611 = vmatprep.subr.mxu1 %v1805_v0  ;;  %779 = vmatprep.subr.mxu0 %v665_v18  ;;  %v415_v18 = vld [vmem:[%s2129_s2] sm:$0x7] }
  0x65   : > { %1612 = vmatpush3.msra.mxu1 %v387_v7  ;;  %780 = vmatpush2.msra.mxu0 %v664_v20  ;;  %v685_v7 = vld [vmem:[#allocation4 + $0x348] sm:$0xff] }
  0x66   : > { %1613 = vmatprep.subr.mxu1 %v1805_v0  ;;  %781 = vmatprep.subr.mxu0 %v662_v21 }
  0x67   : > { %1614 = vmatpush3.msra.mxu1 %v384_v10  ;;  %782 = vmatpush2.msra.mxu0 %v661_v22  ;;  %v680_v10 = vld [vmem:[#allocation4 + $0x320] sm:$0xff] }
  0x68   : > { %1615 = vmatprep.subr.mxu1 %v1805_v0  ;;  %783 = vmatprep.subr.mxu0 %v659_v23 }
  0x69   : > { %1616 = vmatpush3.msra.mxu1 %v381_v13  ;;  %784 = vmatpush2.msra.mxu0 %v658_v24  ;;  %v676_v13 = vld [vmem:[#allocation4 + $0x300] sm:$0xff] }
  0x6a   : > { %1617 = vmatprep.subr.mxu1 %v1805_v0  ;;  %785 = vmatprep.subr.mxu0 %v656_v25 }
  0x6b   : > { %1618 = vmatpush3.msra.mxu1 %v378_v16  ;;  %786 = vmatpush2.msra.mxu0 %v655_v26  ;;  %v1967_v16 = vshrl.u32 %v417_v15, 7  ;;  %v630_v15 = vld [vmem:[#allocation4 + $0x190] sm:$0xff] }
  0x6c   : > { %1619 = vmatprep.subr.mxu1 %v1805_v0  ;;  %787 = vmatprep.subr.mxu0 %v653_v27 }
  0x6d   : > { %1620 = vmatpush3.msra.mxu1 %v375_v19  ;;  %788 = vmatpush2.msra.mxu0 %v652_v28  ;;  %v1970_v17 = vsub.s32 0, %v1967_v16  ;;  %v1976_v19 = vsub.s32 1, %v1967_v16  ;;  %v723_v28 = vld [vmem:[#allocation4 + $0x478] sm:$0xff] }
  0x6e   : > { %1622 = vmatmul.mubr.msk.f32.vlgmr.msra.gmra.mxu1 %vm432_vm0, %v1943_v43  ;;  %789 = vmatprep.subr.mxu0 %v650_v29  ;;  %v719_v43 = vld [vmem:[#allocation4 + $0x458] sm:$0xff]  ;;  %v720_v29 = vld [vmem:[#allocation4 + $0x460] sm:$0xff] }
  0x6f   : > { %876 = vmatprep.mubr.f32.mxu1 %v1805_v0  ;;  %790 = vmatpush2.msra.mxu0 %v649_v30  ;;  %v420_v20 = vrot.slane %v415_v18, %v1970_v17  ;;  %v424_v21 = vrot.slane %v415_v18, %v1976_v19  ;;  %v717_v30 = vld [vmem:[#allocation4 + $0x448] sm:$0xff] }
  0x70   : > { %791 = vmatprep.subr.mxu0 %v647_v31  ;;  %812 = vmatprep.subr.mxu1 %v722_v39  ;;  %v714_v31 = vld [vmem:[#allocation4 + $0x430] sm:$0xff] }
  0x71   : > { %792 = vmatpush2.msra.mxu0 %v646_v32  ;;  %813 = vmatpush1.msra.mxu1 %v721_v41  ;;  %v711_v32 = vld [vmem:[#allocation4 + $0x418] sm:$0xff] }
  0x72   : > { %793 = vmatprep.subr.mxu0 %v644_v33  ;;  %814 = vmatprep.subr.mxu1 %v719_v43  ;;  %v708_v33 = vld [vmem:[#allocation4 + $0x400] sm:$0xff] }
  0x73   : > { %794 = vmatpush2.msra.mxu0 %v643_v34  ;;  %815 = vmatpush1.msra.mxu1 %v718_v45  ;;  %v705_v34 = vld [vmem:[#allocation4 + $0x3e8] sm:$0xff]  ;;  %v687_v45 = vld [vmem:[#allocation4 + $0x358] sm:$0xff] }
  0x74   : > { %795 = vmatprep.subr.mxu0 %v641_v35  ;;  %816 = vmatprep.subr.mxu1 %v716_v47  ;;  %v702_v35 = vld [vmem:[#allocation4 + $0x3d0] sm:$0xff]  ;;  %v627_v47 = vld [vmem:[#allocation4 + $0x178] sm:$0xff] }
  0x75   : > { %796 = vmatpush2.msra.mxu0 %v640_v36  ;;  %817 = vmatpush1.msra.mxu1 %v715_v49  ;;  %v427_v36 = vsub.s32 2, %v1967_v16  ;;  %v684_v49 = vld [vmem:[#allocation4 + $0x340] sm:$0xff] }
  0x76   : > { %797 = vmatprep.subr.mxu0 %v638_v37  ;;  %818 = vmatprep.subr.mxu1 %v713_v51  ;;  %v699_v37 = vld [vmem:[#allocation4 + $0x3b8] sm:$0xff]  ;;  %v669_v51 = vld [vmem:[#allocation4 + $0x2c8] sm:$0xff]  ;;  %v1292_v16 = vld [vmem:[%s2134_s7 + $0x70] sm:$0xff] }
  0x77   : > { %798 = vmatpush2.msra.mxu0 %v637_v38  ;;  %819 = vmatpush1.msra.mxu1 %v712_v52  ;;  %v696_v38 = vld [vmem:[#allocation4 + $0x3a0] sm:$0xff]  ;;  %v428_v39 = vrot.slane %v415_v18, %v427_v36  ;;  %v681_v52 = vld [vmem:[#allocation4 + $0x328] sm:$0xff]  ;;  %v582_v18 = vld [vmem:[#allocation4 + $0x10] sm:$0xff] }
  0x78   : > { %799 = vmatprep.subr.mxu0 %v635_v40  ;;  %820 = vmatprep.subr.mxu1 %v710_v53  ;;  %v693_v40 = vld [vmem:[#allocation4 + $0x388] sm:$0xff] }
  0x79   : > { %800 = vmatpush2.msra.mxu0 %v634_v42  ;;  %821 = vmatpush1.msra.mxu1 %v709_v54  ;;  %v690_v42 = vld [vmem:[#allocation4 + $0x370] sm:$0xff]  ;;  %v621_v53 = vld [vmem:[#allocation4 + $0x148] sm:$0xff] }
  0x7a   : > { %801 = vmatprep.subr.mxu0 %v632_v44  ;;  %822 = vmatprep.subr.mxu1 %v707_v55  ;;  %v666_v54 = vld [vmem:[#allocation4 + $0x2b0] sm:$0xff] }
  0x7b   : > { %802 = vmatpush2.msra.mxu0 %v631_v46  ;;  %823 = vmatpush1.msra.mxu1 %v706_v56  ;;  %v678_v55 = vld [vmem:[#allocation4 + $0x310] sm:$0xff] }
  0x7c   : > { %803 = vmatprep.subr.mxu0 %v629_v48  ;;  %824 = vmatprep.subr.mxu1 %v704_v57  ;;  %v672_v48 = vld [vmem:[#allocation4 + $0x2e0] sm:$0xff]  ;;  %v618_v56 = vld [vmem:[#allocation4 + $0x130] sm:$0xff]  ;;  %v663_v57 = vld [vmem:[#allocation4 + $0x298] sm:$0xff] }
  0x7d   : > { %804 = vmatpush2.msra.mxu0 %v628_v50  ;;  %825 = vmatpush1.msra.mxu1 %v703_v58  ;;  %v624_v50 = vld [vmem:[#allocation4 + $0x160] sm:$0xff]  ;;  %v615_v58 = vld [vmem:[#allocation4 + $0x118] sm:$0xff] }
  0x7e   : > { %1624 = vmatprep.subr.mxu0 %v1805_v0  ;;  %826 = vmatprep.subr.mxu1 %v701_v59  ;;  %v660_v59 = vld [vmem:[#allocation4 + $0x280] sm:$0xff] }
  0x7f   : > { %827 = vmatpush1.msra.mxu1 %v700_v60  ;;  %v612_v60 = vld [vmem:[#allocation4 + $0x100] sm:$0xff] }
  0x80   : > { %828 = vmatprep.subr.mxu1 %v698_v61  ;;  %v657_v61 = vld [vmem:[#allocation4 + $0x268] sm:$0xff] }
  0x81   : > { %829 = vmatpush1.msra.mxu1 %v697_v62  ;;  %v609_v62 = vld [vmem:[#allocation4 + $0xe8] sm:$0xff] }
  0x82   : > { %830 = vmatprep.subr.mxu1 %v695_v63  ;;  %v654_v63 = vld [vmem:[#allocation4 + $0x250] sm:$0xff] }
  0x83   : > { %831 = vmatpush1.msra.mxu1 %v694_v1  ;;  %v606_v1 = vld [vmem:[#allocation4 + $0xd0] sm:$0xff] }
  0x84   : > { %832 = vmatprep.subr.mxu1 %v692_v2  ;;  %v651_v2 = vld [vmem:[#allocation4 + $0x238] sm:$0xff] }
  0x85   : > { %833 = vmatpush1.msra.mxu1 %v691_v3  ;;  %v603_v3 = vld [vmem:[#allocation4 + $0xb8] sm:$0xff] }
  0x86   : > { %834 = vmatprep.subr.mxu1 %v689_v4  ;;  %v648_v4 = vld [vmem:[#allocation4 + $0x220] sm:$0xff] }
  0x87   : > { %835 = vmatpush1.msra.mxu1 %v688_v5  ;;  %v600_v5 = vld [vmem:[#allocation4 + $0xa0] sm:$0xff] }
  0x88   : > { %836 = vmatprep.subr.mxu1 %v686_v6  ;;  %v645_v6 = vld [vmem:[#allocation4 + $0x208] sm:$0xff] }
  0x89   : > { %837 = vmatpush1.msra.mxu1 %v685_v7  ;;  %v597_v7 = vld [vmem:[#allocation4 + $0x88] sm:$0xff] }
  0x8a   : > { %838 = vmatprep.subr.mxu1 %v683_v8  ;;  %v594_v8 = vld [vmem:[#allocation4 + $0x70] sm:$0xff] }
  0x8b   : > { %839 = vmatpush1.msra.mxu1 %v682_v9  ;;  %v639_v9 = vld [vmem:[#allocation4 + $0x1d8] sm:$0xff] }
  0x8c   : > { %840 = vmatprep.subr.mxu1 %v680_v10  ;;  %v591_v10 = vld [vmem:[#allocation4 + $0x58] sm:$0xff] }
  0x8d   : > { %841 = vmatpush1.msra.mxu1 %v679_v11  ;;  %v636_v11 = vld [vmem:[#allocation4 + $0x1c0] sm:$0xff] }
  0x8e   : > { %842 = vmatprep.subr.mxu1 %v677_v12  ;;  %v588_v12 = vld [vmem:[#allocation4 + $0x40] sm:$0xff] }
  0x8f   : > { %843 = vmatpush1.msra.mxu1 %v676_v13  ;;  %v633_v13 = vld [vmem:[#allocation4 + $0x1a8] sm:$0xff] }
  0x90   : > { %1506 = vmatprep.subr.mxu1 %v675_v14  ;;  %v585_v14 = vld [vmem:[#allocation4 + $0x28] sm:$0xff] }
 0x112   : > { %v502_v22 = vpop.f32.mrf.mxu1 }
 0x113   : > { %v1980_v23 = vadd.f32 %v502_v22, %v420_v20  ;;  %v1057_v20 = vld [vmem:[#allocation6 + $0xf8] sm:$0xff]  ;;  %v1055_v22 = vld [vmem:[#allocation6 + $0xe8] sm:$0xff] }
 0x114   : > { %v504_v24 = vpop.f32.mrf.mxu1 }
 0x115   : > { %v505_v25 = vadd.f32 %v504_v24, %v424_v21  ;;  %v577_v27 = vmax.f32 %v1980_v23, 0.0  ;;  %v1056_v21 = vld [vmem:[#allocation6 + $0xf0] sm:$0xff]  ;;  %v1054_v24 = vld [vmem:[#allocation6 + $0xe0] sm:$0xff]  ;;  %v1045_v23 = vld [vmem:[#allocation6 + $0x98] sm:$0xff] }
 0x117   : > { %v578_v26 = vmax.f32 %v505_v25, 0.0  ;;  %v1053_v25 = vld [vmem:[#allocation6 + $0xd8] sm:$0xff] }
 0x119   : > { %805 = vmatprep.mubr.f32.mxu0 %v578_v26 }
 0x11a   : > { %806 = vmatmul.mubr.f32.vlgmr.msra.gmra.mxu0 %v577_v27 }
 0x11b   : > { %1625 = vmatpush3.msra.mxu0 %v723_v28  ;;  %1656 = vmatprep.mubr.msk.f32.mxu0 %vm1806_vm1, %v1805_v0  ;;  %v1051_v28 = vld [vmem:[#allocation6 + $0xc8] sm:$0xff] }
 0x11c   : > { %1626 = vmatprep.subr.mxu0 %v1805_v0 }
 0x11d   : > { %1627 = vmatpush3.msra.mxu0 %v720_v29  ;;  %v1050_v29 = vld [vmem:[#allocation6 + $0xc0] sm:$0xff] }
 0x11e   : > { %1628 = vmatprep.subr.mxu0 %v1805_v0 }
 0x11f   : > { %1629 = vmatpush3.msra.mxu0 %v717_v30  ;;  %v1049_v30 = vld [vmem:[#allocation6 + $0xb8] sm:$0xff] }
 0x120   : > { %1630 = vmatprep.subr.mxu0 %v1805_v0 }
 0x121   : > { %1631 = vmatpush3.msra.mxu0 %v714_v31  ;;  %v1048_v31 = vld [vmem:[#allocation6 + $0xb0] sm:$0xff] }
 0x122   : > { %1632 = vmatprep.subr.mxu0 %v1805_v0 }
 0x123   : > { %1633 = vmatpush3.msra.mxu0 %v711_v32  ;;  %v1047_v32 = vld [vmem:[#allocation6 + $0xa8] sm:$0xff] }
 0x124   : > { %1634 = vmatprep.subr.mxu0 %v1805_v0 }
 0x125   : > { %1635 = vmatpush3.msra.mxu0 %v708_v33  ;;  %v1046_v33 = vld [vmem:[#allocation6 + $0xa0] sm:$0xff] }
 0x126   : > { %1636 = vmatprep.subr.mxu0 %v1805_v0 }
 0x127   : > { %1637 = vmatpush3.msra.mxu0 %v705_v34  ;;  %v1043_v34 = vld [vmem:[#allocation6 + $0x88] sm:$0xff] }
 0x128   : > { %1638 = vmatprep.subr.mxu0 %v1805_v0 }
 0x129   : > { %1639 = vmatpush3.msra.mxu0 %v702_v35  ;;  %v1042_v35 = vld [vmem:[#allocation6 + $0x80] sm:$0xff] }
 0x12a   : > { %1640 = vmatprep.subr.mxu0 %v1805_v0 }
 0x12b   : > { %1641 = vmatpush3.msra.mxu0 %v699_v37  ;;  %v1041_v37 = vld [vmem:[#allocation6 + $0x78] sm:$0xff] }
 0x12c   : > { %1642 = vmatprep.subr.mxu0 %v1805_v0 }
 0x12d   : > { %1643 = vmatpush3.msra.mxu0 %v696_v38  ;;  %v1040_v38 = vld [vmem:[#allocation6 + $0x70] sm:$0xff] }
 0x12e   : > { %1644 = vmatprep.subr.mxu0 %v1805_v0  ;;  %v573_v41 = vpop.f32.mrf.mxu1 }
 0x12f   : > { %v574_v43 = vadd.f32 %v573_v41, %v428_v39  ;;  %1645 = vmatpush3.msra.mxu0 %v693_v40  ;;  %v1039_v39 = vld [vmem:[#allocation6 + $0x68] sm:$0xff]  ;;  %v1038_v40 = vld [vmem:[#allocation6 + $0x60] sm:$0xff]  ;;  %v1037_v41 = vld [vmem:[#allocation6 + $0x58] sm:$0xff] }
 0x130   : > { %1646 = vmatprep.subr.mxu0 %v1805_v0  ;;  %v1623_v44 = vpop.f32.mrf.mxu1 }
 0x131   : > { %v579_v46 = vmax.f32 %v574_v43, 0.0  ;;  %1647 = vmatpush3.msra.mxu0 %v690_v42  ;;  %v1036_v42 = vld [vmem:[#allocation6 + $0x50] sm:$0xff]  ;;  %v1035_v43 = vld [vmem:[#allocation6 + $0x48] sm:$0xff]  ;;  %v1034_v44 = vld [vmem:[#allocation6 + $0x40] sm:$0xff] }
 0x132   : > { %1648 = vmatprep.subr.mxu0 %v1805_v0 }
 0x133   : > { %1649 = vmatpush3.msra.mxu0 %v687_v45  ;;  %877 = vmatmul.mubr.f32.vlgmr.msra.gmra.mxu1 %v579_v46  ;;  %v1033_v45 = vld [vmem:[#allocation6 + $0x38] sm:$0xff] }
 0x134   : > { %1507 = vmatpush3.msra.mxu1 %v627_v47  ;;  %1650 = vmatprep.subr.mxu0 %v1805_v0  ;;  %v1031_v47 = vld [vmem:[#allocation6 + $0x28] sm:$0xff] }
 0x135   : > { %1508 = vmatprep.subr.mxu1 %v672_v48  ;;  %947 = vmatprep.mubr.f32.mxu1 %v578_v26  ;;  %v1052_v26 = vld [vmem:[#allocation6 + $0xd0] sm:$0xff]  ;;  %v1030_v48 = vld [vmem:[#allocation6 + $0x20] sm:$0xff] }
 0x136   : > { %1651 = vmatpush3.msra.mxu0 %v684_v49  ;;  %1509 = vmatpush3.msra.mxu1 %v624_v50  ;;  %v1029_v49 = vld [vmem:[#allocation6 + $0x18] sm:$0xff]  ;;  %v1028_v50 = vld [vmem:[#allocation6 + $0x10] sm:$0xff] }
 0x137   : > { %1652 = vmatprep.subr.mxu0 %v1805_v0  ;;  %1510 = vmatprep.subr.mxu1 %v669_v51  ;;  %v1027_v51 = vld [vmem:[#allocation6 + $0x8] sm:$0xff] }
 0x138   : > { %1653 = vmatpush3.msra.mxu0 %v681_v52  ;;  %1511 = vmatpush3.msra.mxu1 %v621_v53  ;;  %v1026_v52 = vld [vmem:[#allocation6] sm:$0xff]  ;;  %v1089_v53 = vld [vmem:[#allocation6 + $0x1f8] sm:$0xff] }
 0x139   : > { %1654 = vmatprep.subr.mxu0 %v1805_v0  ;;  %1512 = vmatprep.subr.mxu1 %v666_v54  ;;  %v1088_v54 = vld [vmem:[#allocation6 + $0x1f0] sm:$0xff] }
 0x13a   : > { %1655 = vmatpush3.msra.mxu0 %v678_v55  ;;  %1513 = vmatpush3.msra.mxu1 %v618_v56  ;;  %v1087_v55 = vld [vmem:[#allocation6 + $0x1e8] sm:$0xff]  ;;  %v1086_v56 = vld [vmem:[#allocation6 + $0x1e0] sm:$0xff] }
 0x13b   : > { %1657 = vmatmul.mubr.f32.vlgmr.msra.gmra.mxu0 %v579_v46  ;;  %1514 = vmatprep.subr.mxu1 %v663_v57  ;;  %v1032_v46 = vld [vmem:[#allocation6 + $0x30] sm:$0xff]  ;;  %v1085_v57 = vld [vmem:[#allocation6 + $0x1d8] sm:$0xff] }
 0x13c   : > { %1515 = vmatpush3.msra.mxu1 %v615_v58  ;;  %1269 = vmatprep.mubr.f32.mxu0 %v1805_v0  ;;  %v642_v0 = vld [vmem:[#allocation4 + $0x1f0] sm:$0xff] }
 0x13d   : > { %1516 = vmatprep.subr.mxu1 %v660_v59  ;;  %v1084_v58 = vld [vmem:[#allocation6 + $0x1d0] sm:$0xff]  ;;  %v1083_v59 = vld [vmem:[#allocation6 + $0x1c8] sm:$0xff] }
 0x13e   : > { %1517 = vmatpush3.msra.mxu1 %v612_v60  ;;  %v1082_v60 = vld [vmem:[#allocation6 + $0x1c0] sm:$0xff] }
 0x13f   : > { %1518 = vmatprep.subr.mxu1 %v657_v61  ;;  %v1081_v61 = vld [vmem:[#allocation6 + $0x1b8] sm:$0xff] }
 0x140   : > { %1519 = vmatpush3.msra.mxu1 %v609_v62  ;;  %v1080_v62 = vld [vmem:[#allocation6 + $0x1b0] sm:$0xff] }
 0x141   : > { %1520 = vmatprep.subr.mxu1 %v654_v63  ;;  %v1079_v63 = vld [vmem:[#allocation6 + $0x1a8] sm:$0xff] }
 0x142   : > { %1521 = vmatpush3.msra.mxu1 %v606_v1  ;;  %v1078_v1 = vld [vmem:[#allocation6 + $0x1a0] sm:$0xff] }
 0x143   : > { %1522 = vmatprep.subr.mxu1 %v651_v2  ;;  %v1077_v2 = vld [vmem:[#allocation6 + $0x198] sm:$0xff] }
 0x144   : > { %1523 = vmatpush3.msra.mxu1 %v603_v3  ;;  %v1076_v3 = vld [vmem:[#allocation6 + $0x190] sm:$0xff] }
 0x145   : > { %1524 = vmatprep.subr.mxu1 %v648_v4  ;;  %v1121_v4 = vld [vmem:[#allocation6 + $0x2f8] sm:$0xff] }
 0x146   : > { %1525 = vmatpush3.msra.mxu1 %v600_v5  ;;  %v1120_v5 = vld [vmem:[#allocation6 + $0x2f0] sm:$0xff]  ;;  %1205 = vmatprep.subr.mxu0 %v1121_v4 }
 0x147   : > { %1526 = vmatprep.subr.mxu1 %v645_v6  ;;  %v1119_v6 = vld [vmem:[#allocation6 + $0x2e8] sm:$0xff]  ;;  %1206 = vmatpush1.msra.mxu0 %v1120_v5 }
 0x148   : > { %1527 = vmatpush3.msra.mxu1 %v597_v7  ;;  %v1075_v7 = vld [vmem:[#allocation6 + $0x188] sm:$0xff]  ;;  %1207 = vmatprep.subr.mxu0 %v1119_v6 }
 0x149   : > { %1528 = vmatprep.subr.mxu1 %v642_v0  ;;  %v1118_v0 = vld [vmem:[#allocation6 + $0x2e0] sm:$0xff] }
 0x14a   : > { %1529 = vmatpush3.msra.mxu1 %v594_v8  ;;  %v1074_v8 = vld [vmem:[#allocation6 + $0x180] sm:$0xff]  ;;  %1208 = vmatpush1.msra.mxu0 %v1118_v0 }
 0x14b   : > { %1530 = vmatprep.subr.mxu1 %v639_v9  ;;  %v1117_v9 = vld [vmem:[#allocation6 + $0x2d8] sm:$0xff] }
 0x14c   : > { %1531 = vmatpush3.msra.mxu1 %v591_v10  ;;  %v1073_v10 = vld [vmem:[#allocation6 + $0x178] sm:$0xff]  ;;  %1209 = vmatprep.subr.mxu0 %v1117_v9 }
 0x14d   : > { %1532 = vmatprep.subr.mxu1 %v636_v11  ;;  %v1116_v11 = vld [vmem:[#allocation6 + $0x2d0] sm:$0xff] }
 0x14e   : > { %1533 = vmatpush3.msra.mxu1 %v588_v12  ;;  %v1072_v12 = vld [vmem:[#allocation6 + $0x170] sm:$0xff]  ;;  %1210 = vmatpush1.msra.mxu0 %v1116_v11 }
 0x14f   : > { %1534 = vmatprep.subr.mxu1 %v633_v13  ;;  %v1115_v13 = vld [vmem:[#allocation6 + $0x2c8] sm:$0xff] }
 0x150   : > { %1535 = vmatpush3.msra.mxu1 %v585_v14  ;;  %v1071_v14 = vld [vmem:[#allocation6 + $0x168] sm:$0xff]  ;;  %1211 = vmatprep.subr.mxu0 %v1115_v13 }
 0x151   : > { %1536 = vmatprep.subr.mxu1 %v630_v15  ;;  %v1114_v15 = vld [vmem:[#allocation6 + $0x2c0] sm:$0xff] }
 0x152   : > { %1537 = vmatpush3.msra.mxu1 %v582_v18  ;;  %v1070_v18 = vld [vmem:[#allocation6 + $0x160] sm:$0xff]  ;;  %1212 = vmatpush1.msra.mxu0 %v1114_v15  ;;  %v1309_v15 = vld [vmem:[%s2134_s7 + $0xf8] sm:$0xff] }
 0x153   : > { %948 = vmatmul.mubr.f32.vlgmr.msra.gmra.mxu1 %v577_v27  ;;  %1134 = vmatprep.subr.mxu1 %v1057_v20  ;;  %v1044_v27 = vld [vmem:[#allocation6 + $0x90] sm:$0xff]  ;;  %v1113_v20 = vld [vmem:[#allocation6 + $0x2b8] sm:$0xff] }
 0x154   : > { %1135 = vmatpush1.msra.mxu1 %v1056_v21  ;;  %v1069_v21 = vld [vmem:[#allocation6 + $0x158] sm:$0xff]  ;;  %1213 = vmatprep.subr.mxu0 %v1113_v20  ;;  %v1308_v20 = vld [vmem:[%s2134_s7 + $0xf0] sm:$0xff] }
 0x155   : > { %1136 = vmatprep.subr.mxu1 %v1055_v22  ;;  %v1112_v22 = vld [vmem:[#allocation6 + $0x2b0] sm:$0xff] }
 0x156   : > { %1137 = vmatpush1.msra.mxu1 %v1054_v24  ;;  %v1068_v24 = vld [vmem:[#allocation6 + $0x150] sm:$0xff]  ;;  %1214 = vmatpush1.msra.mxu0 %v1112_v22 }
 0x157   : > { %1138 = vmatprep.subr.mxu1 %v1053_v25  ;;  %v1111_v25 = vld [vmem:[#allocation6 + $0x2a8] sm:$0xff]  ;;  %v1306_v22 = vld [vmem:[%s2134_s7 + $0xe0] sm:$0xff] }
 0x158   : > { %1139 = vmatpush1.msra.mxu1 %v1052_v26  ;;  %v1067_v26 = vld [vmem:[#allocation6 + $0x148] sm:$0xff]  ;;  %1215 = vmatprep.subr.mxu0 %v1111_v25 }
 0x159   : > { %1140 = vmatprep.subr.mxu1 %v1051_v28  ;;  %v1110_v28 = vld [vmem:[#allocation6 + $0x2a0] sm:$0xff]  ;;  %v1305_v25 = vld [vmem:[%s2134_s7 + $0xd8] sm:$0xff] }
 0x15a   : > { %1141 = vmatpush1.msra.mxu1 %v1050_v29  ;;  %v1066_v29 = vld [vmem:[#allocation6 + $0x140] sm:$0xff]  ;;  %1216 = vmatpush1.msra.mxu0 %v1110_v28 }
 0x15b   : > { %1142 = vmatprep.subr.mxu1 %v1049_v30  ;;  %v1109_v30 = vld [vmem:[#allocation6 + $0x298] sm:$0xff]  ;;  %v1304_v28 = vld [vmem:[%s2134_s7 + $0xd0] sm:$0xff] }
 0x15c   : > { %1143 = vmatpush1.msra.mxu1 %v1048_v31  ;;  %v1065_v31 = vld [vmem:[#allocation6 + $0x138] sm:$0xff]  ;;  %1217 = vmatprep.subr.mxu0 %v1109_v30 }
 0x15d   : > { %1144 = vmatprep.subr.mxu1 %v1047_v32  ;;  %v1108_v32 = vld [vmem:[#allocation6 + $0x290] sm:$0xff]  ;;  %v1303_v30 = vld [vmem:[%s2134_s7 + $0xc8] sm:$0xff] }
 0x15e   : > { %1145 = vmatpush1.msra.mxu1 %v1046_v33  ;;  %v1064_v33 = vld [vmem:[#allocation6 + $0x130] sm:$0xff]  ;;  %1218 = vmatpush1.msra.mxu0 %v1108_v32 }
 0x15f   : > { %1146 = vmatprep.subr.mxu1 %v1045_v23  ;;  %v1107_v23 = vld [vmem:[#allocation6 + $0x288] sm:$0xff]  ;;  %v1302_v32 = vld [vmem:[%s2134_s7 + $0xc0] sm:$0xff] }
 0x160   : > { %1147 = vmatpush1.msra.mxu1 %v1044_v27  ;;  %v1063_v27 = vld [vmem:[#allocation6 + $0x128] sm:$0xff]  ;;  %1219 = vmatprep.subr.mxu0 %v1107_v23 }
 0x161   : > { %1148 = vmatprep.subr.mxu1 %v1043_v34  ;;  %v1106_v34 = vld [vmem:[#allocation6 + $0x280] sm:$0xff]  ;;  %v1301_v23 = vld [vmem:[%s2134_s7 + $0xb8] sm:$0xff] }
 0x162   : > { %1149 = vmatpush1.msra.mxu1 %v1042_v35  ;;  %v1062_v35 = vld [vmem:[#allocation6 + $0x120] sm:$0xff]  ;;  %1220 = vmatpush1.msra.mxu0 %v1106_v34 }
 0x163   : > { %1150 = vmatprep.subr.mxu1 %v1041_v37  ;;  %v1105_v37 = vld [vmem:[#allocation6 + $0x278] sm:$0xff]  ;;  %v1300_v34 = vld [vmem:[%s2134_s7 + $0xb0] sm:$0xff] }
 0x164   : > { %1151 = vmatpush1.msra.mxu1 %v1040_v38  ;;  %v1061_v38 = vld [vmem:[#allocation6 + $0x118] sm:$0xff]  ;;  %1221 = vmatprep.subr.mxu0 %v1105_v37 }
 0x165   : > { %1152 = vmatprep.subr.mxu1 %v1039_v39  ;;  %v1104_v39 = vld [vmem:[#allocation6 + $0x270] sm:$0xff]  ;;  %v1299_v37 = vld [vmem:[%s2134_s7 + $0xa8] sm:$0xff] }
 0x166   : > { %1153 = vmatpush1.msra.mxu1 %v1038_v40  ;;  %v1060_v40 = vld [vmem:[#allocation6 + $0x110] sm:$0xff]  ;;  %1222 = vmatpush1.msra.mxu0 %v1104_v39 }
 0x167   : > { %1154 = vmatprep.subr.mxu1 %v1037_v41  ;;  %v1103_v41 = vld [vmem:[#allocation6 + $0x268] sm:$0xff]  ;;  %v1298_v39 = vld [vmem:[%s2134_s7 + $0xa0] sm:$0xff] }
 0x168   : > { %1155 = vmatpush1.msra.mxu1 %v1036_v42  ;;  %v1059_v42 = vld [vmem:[#allocation6 + $0x108] sm:$0xff]  ;;  %1223 = vmatprep.subr.mxu0 %v1103_v41 }
 0x169   : > { %1156 = vmatprep.subr.mxu1 %v1035_v43  ;;  %v1102_v43 = vld [vmem:[#allocation6 + $0x260] sm:$0xff]  ;;  %v1297_v41 = vld [vmem:[%s2134_s7 + $0x98] sm:$0xff] }
 0x16a   : > { %1157 = vmatpush1.msra.mxu1 %v1034_v44  ;;  %v1058_v44 = vld [vmem:[#allocation6 + $0x100] sm:$0xff]  ;;  %1224 = vmatpush1.msra.mxu0 %v1102_v43 }
 0x16b   : > { %1158 = vmatprep.subr.mxu1 %v1033_v45  ;;  %v1101_v45 = vld [vmem:[#allocation6 + $0x258] sm:$0xff]  ;;  %v1296_v43 = vld [vmem:[%s2134_s7 + $0x90] sm:$0xff] }
 0x16c   : > { %1159 = vmatpush1.msra.mxu1 %v1032_v46  ;;  %1225 = vmatprep.subr.mxu0 %v1101_v45  ;;  %v1100_v46 = vld [vmem:[#allocation6 + $0x250] sm:$0xff]  ;;  %v1295_v45 = vld [vmem:[%s2134_s7 + $0x88] sm:$0xff] }
 0x16d   : > { %1160 = vmatprep.subr.mxu1 %v1031_v47  ;;  %v1099_v47 = vld [vmem:[#allocation6 + $0x248] sm:$0xff]  ;;  %1226 = vmatpush1.msra.mxu0 %v1100_v46  ;;  %v1279_v46 = vld [vmem:[%s2134_s7 + $0x8] sm:$0xff] }
 0x16e   : > { %1161 = vmatpush1.msra.mxu1 %v1030_v48  ;;  %1227 = vmatprep.subr.mxu0 %v1099_v47  ;;  %v1098_v48 = vld [vmem:[#allocation6 + $0x240] sm:$0xff]  ;;  %v1294_v47 = vld [vmem:[%s2134_s7 + $0x80] sm:$0xff] }
 0x16f   : > { %1162 = vmatprep.subr.mxu1 %v1029_v49  ;;  %1228 = vmatpush1.msra.mxu0 %v1098_v48  ;;  %v1097_v49 = vld [vmem:[#allocation6 + $0x238] sm:$0xff]  ;;  %v1278_v48 = vld [vmem:[%s2134_s7] sm:$0xff] }
 0x170   : > { %1163 = vmatpush1.msra.mxu1 %v1028_v50  ;;  %1229 = vmatprep.subr.mxu0 %v1097_v49  ;;  %v1096_v50 = vld [vmem:[#allocation6 + $0x230] sm:$0xff] }
 0x171   : > { %1164 = vmatprep.subr.mxu1 %v1027_v51  ;;  %1230 = vmatpush1.msra.mxu0 %v1096_v50  ;;  %v1095_v51 = vld [vmem:[#allocation6 + $0x228] sm:$0xff]  ;;  %v1122_v49 = vld [vmem:[%s2133_s6] sm:$0x3] }
 0x172   : > { %1165 = vmatpush1.msra.mxu1 %v1026_v52  ;;  %1231 = vmatprep.subr.mxu0 %v1095_v51  ;;  %v1094_v52 = vld [vmem:[#allocation6 + $0x220] sm:$0xff]  ;;  %v1127_v51 = vrot.slane %v1122_v49, %v1970_v17 }
 0x173   : > { %1166 = vmatprep.subr.mxu1 %v1089_v53  ;;  %1232 = vmatpush1.msra.mxu0 %v1094_v52  ;;  %v1093_v53 = vld [vmem:[#allocation6 + $0x218] sm:$0xff]  ;;  %v1131_v52 = vrot.slane %v1122_v49, %v1976_v19 }
 0x174   : > { %1167 = vmatpush2.msra.mxu1 %v1088_v54  ;;  %1233 = vmatprep.subr.mxu0 %v1093_v53  ;;  %v1092_v54 = vld [vmem:[#allocation6 + $0x210] sm:$0xff] }
 0x175   : > { %1168 = vmatprep.subr.mxu1 %v1087_v55  ;;  %1234 = vmatpush1.msra.mxu0 %v1092_v54  ;;  %v1091_v55 = vld [vmem:[#allocation6 + $0x208] sm:$0xff] }
 0x176   : > { %1169 = vmatpush2.msra.mxu1 %v1086_v56  ;;  %v1090_v56 = vld [vmem:[#allocation6 + $0x200] sm:$0xff]  ;;  %1235 = vmatprep.subr.mxu0 %v1091_v55 }
 0x177   : > { %1170 = vmatprep.subr.mxu1 %v1085_v57  ;;  %1236 = vmatpush1.msra.mxu0 %v1090_v56  ;;  %v724_v57 = vld [vmem:[%s2131_s4] sm:$0x7] }
 0x178   : > { %1171 = vmatpush2.msra.mxu1 %v1084_v58  ;;  %v737_v9 = vrot.slane %v724_v57, %v427_v36  ;;  %1558 = vmatprep.subr.mxu0 %v1309_v15  ;;  %v1307_v36 = vld [vmem:[%s2134_s7 + $0xe8] sm:$0xff] }
 0x179   : > { %1172 = vmatprep.subr.mxu1 %v1083_v59  ;;  %v729_v59 = vrot.slane %v724_v57, %v1970_v17 }
 0x17a   : > { %1173 = vmatpush2.msra.mxu1 %v1082_v60  ;;  %v733_v60 = vrot.slane %v724_v57, %v1976_v19 }
 0x17b   : > { %1174 = vmatprep.subr.mxu1 %v1081_v61 }
 0x17c   : > { %1175 = vmatpush2.msra.mxu1 %v1080_v62 }
 0x17d   : > { %1176 = vmatprep.subr.mxu1 %v1079_v63 }
 0x17e   : > { %1177 = vmatpush2.msra.mxu1 %v1078_v1 }
 0x17f   : > { %1178 = vmatprep.subr.mxu1 %v1077_v2 }
 0x180   : > { %1179 = vmatpush2.msra.mxu1 %v1076_v3 }
 0x181   : > { %1180 = vmatprep.subr.mxu1 %v1075_v7 }
 0x182   : > { %1181 = vmatpush2.msra.mxu1 %v1074_v8 }
 0x183   : > { %1182 = vmatprep.subr.mxu1 %v1073_v10 }
 0x184   : > { %1183 = vmatpush2.msra.mxu1 %v1072_v12 }
 0x185   : > { %1184 = vmatprep.subr.mxu1 %v1071_v14 }
 0x186   : > { %1185 = vmatpush2.msra.mxu1 %v1070_v18  ;;  %v1293_v18 = vld [vmem:[%s2134_s7 + $0x78] sm:$0xff] }
 0x187   : > { %1186 = vmatprep.subr.mxu1 %v1069_v21  ;;  %v1291_v21 = vld [vmem:[%s2134_s7 + $0x68] sm:$0xff] }
 0x188   : > { %1187 = vmatpush2.msra.mxu1 %v1068_v24  ;;  %v1290_v24 = vld [vmem:[%s2134_s7 + $0x60] sm:$0xff] }
 0x189   : > { %1188 = vmatprep.subr.mxu1 %v1067_v26  ;;  %v1289_v26 = vld [vmem:[%s2134_s7 + $0x58] sm:$0xff] }
 0x18a   : > { %1189 = vmatpush2.msra.mxu1 %v1066_v29  ;;  %v1288_v29 = vld [vmem:[%s2134_s7 + $0x50] sm:$0xff] }
 0x18b   : > { %1190 = vmatprep.subr.mxu1 %v1065_v31  ;;  %v1287_v31 = vld [vmem:[%s2134_s7 + $0x48] sm:$0xff] }
 0x18c   : > { %1191 = vmatpush2.msra.mxu1 %v1064_v33  ;;  %v1286_v33 = vld [vmem:[%s2134_s7 + $0x40] sm:$0xff] }
 0x18d   : > { %1192 = vmatprep.subr.mxu1 %v1063_v27  ;;  %v1285_v27 = vld [vmem:[%s2134_s7 + $0x38] sm:$0xff] }
 0x18e   : > { %1193 = vmatpush2.msra.mxu1 %v1062_v35  ;;  %v1284_v35 = vld [vmem:[%s2134_s7 + $0x30] sm:$0xff] }
 0x18f   : > { %1194 = vmatprep.subr.mxu1 %v1061_v38  ;;  %v1283_v38 = vld [vmem:[%s2134_s7 + $0x28] sm:$0xff] }
 0x190   : > { %1195 = vmatpush2.msra.mxu1 %v1060_v40  ;;  %v1282_v40 = vld [vmem:[%s2134_s7 + $0x20] sm:$0xff] }
 0x191   : > { %1196 = vmatprep.subr.mxu1 %v1059_v42  ;;  %v1281_v42 = vld [vmem:[%s2134_s7 + $0x18] sm:$0xff] }
 0x192   : > { %1197 = vmatpush2.msra.mxu1 %v1058_v44  ;;  %v1280_v44 = vld [vmem:[%s2134_s7 + $0x10] sm:$0xff] }
 0x1da   : > { %v807_v58 = vpop.f32.mrf.mxu0 }
 0x1db   : > { %v808_v62 = vadd.f32 %v807_v58, %v729_v59 }
 0x1dc   : > { %v809_v61 = vpop.f32.mrf.mxu0 }
 0x1dd   : > { %v810_v1 = vadd.f32 %v809_v61, %v733_v60 }
 0x1f3   : > { %v878_v63 = vpop.f32.mrf.mxu1 }
 0x1f4   : > { %v879_v2 = vadd.f32 %v878_v63, %v808_v62  ;;  %v1488_v63 = vld [vmem:[%s2135_s8] ss:$0 sm:$0xff] }
 0x1f5   : > { %v880_v3 = vpop.f32.mrf.mxu1 }
 0x1f6   : > { %v881_v4 = vadd.f32 %v880_v3, %v810_v1  ;;  %v1023_v6 = vmax.f32 %v879_v2, 0.0 }
 0x1f8   : > { %v1024_v5 = vmax.f32 %v881_v4, 0.0 }
 0x1fa   : > { %1198 = vmatprep.mubr.f32.mxu1 %v1024_v5 }
 0x1fb   : > { %v1019_v7 = vpop.f32.mrf.mxu0  ;;  %1199 = vmatmul.mubr.f32.vlgmr.msra.gmra.mxu1 %v1023_v6 }
 0x1fd   : > { %v1658_v0 = vpop.f32.mrf.mxu0 }
 0x213   : > { %v1538_v8 = vpop.f32.mrf.mxu1 }
 0x215   : > { %v1539_v10 = vpop.f32.mrf.mxu1 }
 0x216   : > { %v1540_v11 = vadd.f32 %v1539_v10, %v1538_v8 }
 0x218   : > { %v950_v12 = vadd.f32 %v1540_v11, %v737_v9 }
 0x21a   : > { %v1020_v13 = vadd.f32 %v1019_v7, %v950_v12 }
 0x21c   : > { %v1025_v14 = vmax.f32 %v1020_v13, 0.0 }
 0x21e   : > { %1270 = vmatmul.mubr.f32.vlgmr.msra.gmra.mxu0 %v1025_v14 }
 0x21f   : > { %1559 = vmatpush3.msra.mxu0 %v1293_v18 }
 0x220   : > { %1560 = vmatprep.subr.mxu0 %v1308_v20 }
 0x221   : > { %1561 = vmatpush3.msra.mxu0 %v1292_v16 }
 0x222   : > { %1562 = vmatprep.subr.mxu0 %v1307_v36 }
 0x223   : > { %1563 = vmatpush3.msra.mxu0 %v1291_v21 }
 0x224   : > { %1564 = vmatprep.subr.mxu0 %v1306_v22 }
 0x225   : > { %1565 = vmatpush3.msra.mxu0 %v1290_v24 }
 0x226   : > { %1566 = vmatprep.subr.mxu0 %v1305_v25 }
 0x227   : > { %1567 = vmatpush3.msra.mxu0 %v1289_v26 }
 0x228   : > { %1568 = vmatprep.subr.mxu0 %v1304_v28 }
 0x229   : > { %1569 = vmatpush3.msra.mxu0 %v1288_v29 }
 0x22a   : > { %1570 = vmatprep.subr.mxu0 %v1303_v30 }
 0x22b   : > { %1571 = vmatpush3.msra.mxu0 %v1287_v31 }
 0x22c   : > { %1572 = vmatprep.subr.mxu0 %v1302_v32 }
 0x22d   : > { %1573 = vmatpush3.msra.mxu0 %v1286_v33 }
 0x22e   : > { %1574 = vmatprep.subr.mxu0 %v1301_v23 }
 0x22f   : > { %1575 = vmatpush3.msra.mxu0 %v1285_v27 }
 0x230   : > { %1576 = vmatprep.subr.mxu0 %v1300_v34 }
 0x231   : > { %1577 = vmatpush3.msra.mxu0 %v1284_v35 }
 0x232   : > { %1578 = vmatprep.subr.mxu0 %v1299_v37 }
 0x233   : > { %1579 = vmatpush3.msra.mxu0 %v1283_v38 }
 0x234   : > { %1580 = vmatprep.subr.mxu0 %v1298_v39 }
 0x235   : > { %1581 = vmatpush3.msra.mxu0 %v1282_v40 }
 0x236   : > { %1582 = vmatprep.subr.mxu0 %v1297_v41 }
 0x237   : > { %1583 = vmatpush3.msra.mxu0 %v1281_v42 }
 0x238   : > { %1584 = vmatprep.subr.mxu0 %v1296_v43 }
 0x239   : > { %1585 = vmatpush3.msra.mxu0 %v1280_v44 }
 0x23a   : > { %1586 = vmatprep.subr.mxu0 %v1295_v45 }
 0x23b   : > { %1587 = vmatpush3.msra.mxu0 %v1279_v46 }
 0x23c   : > { %1588 = vmatprep.subr.mxu0 %v1294_v47 }
 0x23d   : > { %1589 = vmatpush3.msra.mxu0 %v1278_v48 }
 0x2bb   : > { %v1200_v50 = vpop.f32.mrf.mxu1 }
 0x2bc   : > { %v1201_v54 = vadd.f32 %v1200_v50, %v1127_v51 }
 0x2bd   : > { %v1202_v53 = vpop.f32.mrf.mxu1 }
 0x2be   : > { %v1203_v56 = vadd.f32 %v1202_v53, %v1131_v52 }
 0x2de   : > { %v1271_v55 = vpop.f32.mrf.mxu0 }
 0x2df   : > { %v1272_v57 = vadd.f32 %v1271_v55, %v1201_v54 }
 0x2e0   : > { %v1273_v58 = vpop.f32.mrf.mxu0 }
 0x2e1   : > { %v1274_v59 = vadd.f32 %v1273_v58, %v1203_v56  ;;  %v1276_v61 = vmax.f32 %v1272_v57, 0.0 }
 0x2e3   : > { %v1277_v60 = vmax.f32 %v1274_v59, 0.0 }
 0x2e5   : > { %1381 = vmatprep.mubr.f32.mxu0 %v1277_v60 }
 0x2e6   : > { %1382 = vmatmul.mubr.f32.vlgmr.msra.gmra.mxu0 %v1276_v61 }
 0x3a6   : > { %v1590_v62 = vpop.f32.mrf.mxu0 }
 0x3a8   : > { %v1591_v17 = vpop.f32.mrf.mxu0 }
 0x3a9   : > { %v1592_v1 = vadd.f32 %v1591_v17, %v1590_v62 }
 0x3ab   : > { %v1384_v19 = vadd.f32 %v1592_v1, %v1488_v63 }
 0x3ad   : > { %1388 = vst.msk [vmem:[%s371_s19] sm:$0xff] %vm1387_vm2, %v1384_v19 }
 0x3ae PF: > { %s21_s30 = sadd.s32 1, %s1796_s30  }
 0x3af   : > { %p18_p3 = scmp.ge.s32.totalorder %s21_s30, 5  }
 0x3b1   :  { %20 = sbr.rel (!%p18_p3) target bundleno = 2 (0x2), region = 99 }
 0x3b6   :  { %1408 = vsyncpa [#allocation3], 1 }
 0x3b7   :  { %1410 = vsyncpa [#allocation3 + $0x1], 1 }
 0x3b8   :  { %1411 = vsyncpa [#allocation5], 1 }

</bundles_post_ra>
